<compile_context>
chip_gen: v7x
topology: tpu7x:2x2x1
jax: 0.10.0
libtpu: 0.0.40
codegen_flags: <defaults>
</compile_context>

<pallas_src>
import jax
import jax.numpy as jnp
from jax.experimental import pallas as pl
from jax.experimental.pallas import tpu as pltpu

_NEG_BIG = -1e30  # finite "-inf" for padded vocab lanes (exp -> 0; avoids 0*inf NaN in the dot)


def _categorical_decoder_kernel(idx_ref, table_ref, out_ref):
    """One-hot MXU gather + numerically-stable row softmax.

    idx_ref  : VMEM int32 (block_n, 1)            -- category ids for this row block
    table_ref: VMEM f32   (output_size, voc_pad)  -- full table, lane-padded, grid-invariant
    out_ref  : VMEM f32   (block_n, voc_pad)      -- softmax(table[idx], axis=-1) (padded lanes ~0)
    """
    block_n = out_ref.shape[0]
    output_size = table_ref.shape[0]

    # Clamp inside the kernel: free VPU compare next to the MXU/EUP work, and it removes
    # a standalone XLA op + extra HBM pass over idx in the wrapper.
    idx = jnp.clip(idx_ref[...], 0, output_size - 1)

    # Gather via one-hot matmul on the otherwise-idle MXU.  HIGHEST precision keeps the
    # gathered f32 rows identical to the table rows (no bf16-pass rounding before exp).
    iota = jax.lax.broadcasted_iota(jnp.int32, (block_n, output_size), 1)
    onehot = (iota == idx).astype(table_ref.dtype)
    rows = jnp.dot(
        onehot,
        table_ref[...],
        preferred_element_type=jnp.float32,
        precision=jax.lax.Precision.HIGHEST,
    )

    # Numerically-stable softmax over the (lane-padded) vocab axis.  Padded lanes carry
    # _NEG_BIG so they don't affect max/sum.  Exact divide: rows sum to 1 for downstream
    # consumers that treat the output as probabilities.
    m = jnp.max(rows, axis=-1, keepdims=True)
    e = jnp.exp(rows - m)
    denom = jnp.sum(e, axis=-1, keepdims=True)
    out_ref[...] = (e / denom).astype(out_ref.dtype)


def categorical_decoder(x, table, *, block_n=None):
    """x: (N,) int ids, table: (output_size, voc_size) f32 -> squeeze(softmax(table[x], -1))."""
    n = x.shape[0]
    output_size, voc_size = table.shape

    idx = x.astype(jnp.int32).reshape(n, 1)

    # --- batch tiling --------------------------------------------------------------
    # Large tiles amortize the ~0.35 us/step grid overhead and fill the MXU's rows; for
    # batches larger than one tile the grid has >= 2 "parallel" blocks for v7x's 2 TCs.
    if block_n is None:
        target = 512
        n8 = ((n + 7) // 8) * 8
        block_n = n8 if n8 <= target else target
    block_n = max(8, (block_n // 8) * 8)
    n_blocks = pl.cdiv(n, block_n)
    n_pad = n_blocks * block_n
    if n_pad != n:
        idx = jnp.pad(idx, ((0, n_pad - n), (0, 0)))

    # --- lane-dense output ---------------------------------------------------------
    # A vocab width off a 128 multiple makes every store a masked partial vst.  Pad the
    # vocab axis with a large-negative constant so exp -> 0 on padded lanes and stores
    # are full unmasked vregs; real columns are sliced back out below.
    voc_pad = ((voc_size + 127) // 128) * 128
    if voc_pad != voc_size:
        table_k = jnp.pad(table, ((0, 0), (0, voc_pad - voc_size)),
                          constant_values=_NEG_BIG)
    else:
        table_k = table

    out = pl.pallas_call(
        _categorical_decoder_kernel,
        out_shape=jax.ShapeDtypeStruct((n_pad, voc_pad), table.dtype),
        grid_spec=pl.GridSpec(
            grid=(n_blocks,),
            in_specs=[
                pl.BlockSpec((block_n, 1), lambda i: (i, 0)),
                # Grid-invariant full table stays resident in VMEM across the batch axis.
                pl.BlockSpec((output_size, voc_pad), lambda i: (0, 0)),
            ],
            out_specs=pl.BlockSpec((block_n, voc_pad), lambda i: (i, 0)),
        ),
        compiler_params=pltpu.CompilerParams(
            dimension_semantics=("parallel",),
        ),
    )(idx, table_k)

    out = out[:n, :voc_size]
    # Mirror torch's .squeeze() (no-op at these sizes).
    return jnp.squeeze(out)


if __name__ == "__main__":
    key = jax.random.PRNGKey(0)
    k_w, k_x = jax.random.split(key)

    # params['output_size'] = number of categories (embedding rows),
    # params['voc_size']    = embedding / distribution width.
    output_size, voc_size = 64, 32
    batch = 8

    # nn.Embedding weights are ~N(0, 1); deterministic synthetic init here.
    table = jax.random.normal(k_w, (output_size, voc_size), dtype=jnp.float32)
    x = jax.random.randint(k_x, (batch,), 0, output_size, dtype=jnp.int32)

    out = categorical_decoder(x, table)
    out = jax.block_until_ready(out)

    # Pure-JAX reference for correctness.
    ref = jnp.squeeze(jax.nn.softmax(table[x], axis=-1))
    assert out.shape == ref.shape, (out.shape, ref.shape)
    assert jnp.allclose(out, ref, atol=1e-5, rtol=1e-5), float(jnp.max(jnp.abs(out - ref)))

    print("KERNEL_OK")
</pallas_src>

<mosaic_0001>
module attributes {stable_mosaic.version = 11 : i64} {
  func.func @_categorical_decoder_kernel(%arg0: i32, %arg1: memref<8x1xi32, #tpu.memory_space<vmem>>, %arg2: memref<64x128xf32, #tpu.memory_space<vmem>>, %arg3: memref<8x128xf32, #tpu.memory_space<vmem>>) attributes {dimension_semantics = [#tpu.dimension_semantics<parallel>], iteration_bounds = array<i64: 1>, scalar_prefetch = 0 : i64, scratch_operands = 0 : i64, tpu.core_type = #tpu.core_type<tc>, window_params = [{transform_indices = @transform_0, window_bounds = array<i64: 8, 1>}, {pipeline_mode = #tpu.pipeline_mode<synchronous>, transform_indices = @transform_1, window_bounds = array<i64: 64, 128>}, {transform_indices = @transform_2, window_bounds = array<i64: 8, 128>}]} {
    %c0 = arith.constant 0 : index
    %c0_0 = arith.constant 0 : index
    %0 = vector.load %arg1[%c0, %c0_0] : memref<8x1xi32, #tpu.memory_space<vmem>>, vector<8x1xi32>
    %c0_i32 = arith.constant 0 : i32
    %c63_i32 = arith.constant 63 : i32
    %1 = vector.broadcast %c0_i32 : i32 to vector<8x1xi32>
    %2 = arith.maxsi %1, %0 : vector<8x1xi32>
    %3 = vector.broadcast %c63_i32 : i32 to vector<8x1xi32>
    %4 = arith.minsi %3, %2 : vector<8x1xi32>
    %5 = tpu.iota {dimensions = array<i32: 1>} : vector<8x64xi32>
    %6 = vector.broadcast %4 : vector<8x1xi32> to vector<8x64xi32>
    %7 = arith.cmpi eq, %5, %6 : vector<8x64xi32>
    %8 = arith.extui %7 : vector<8x64xi1> to vector<8x64xi32>
    %9 = arith.sitofp %8 : vector<8x64xi32> to vector<8x64xf32>
    %c0_1 = arith.constant 0 : index
    %c0_2 = arith.constant 0 : index
    %10 = vector.load %arg2[%c0_1, %c0_2] : memref<64x128xf32, #tpu.memory_space<vmem>>, vector<64x128xf32>
    %cst = arith.constant dense<0.000000e+00> : vector<8x128xf32>
    %11 = tpu.matmul %9, %10, %cst {dimension_numbers = #tpu.dot_dimension_numbers<[1], [0], [0], [1], [0, 0, 1, 1], [], []>, precision = #tpu.contract_precision<fp32>} : vector<8x64xf32>, vector<64x128xf32>, vector<8x128xf32> -> vector<8x128xf32>
    %cst_3 = arith.constant dense<0xFF800000> : vector<8xf32>
    %12 = vector.multi_reduction <maximumf>, %11, %cst_3 [1] : vector<8x128xf32> to vector<8xf32>
    %13 = vector.shape_cast %12 : vector<8xf32> to vector<8x1xf32>
    %14 = vector.broadcast %13 : vector<8x1xf32> to vector<8x128xf32>
    %15 = arith.subf %11, %14 : vector<8x128xf32>
    %16 = math.exp %15 : vector<8x128xf32>
    %cst_4 = arith.constant dense<0.000000e+00> : vector<8xf32>
    %17 = vector.multi_reduction <add>, %16, %cst_4 [1] : vector<8x128xf32> to vector<8xf32>
    %18 = vector.shape_cast %17 : vector<8xf32> to vector<8x1xf32>
    %19 = vector.broadcast %18 : vector<8x1xf32> to vector<8x128xf32>
    %20 = arith.divf %16, %19 : vector<8x128xf32>
    %c0_5 = arith.constant 0 : index
    %c0_6 = arith.constant 0 : index
    %21 = vector.load %arg3[%c0_5, %c0_6] : memref<8x128xf32, #tpu.memory_space<vmem>>, vector<8x128xf32>
    tpu.vector_store %arg3[%c0_5, %c0_6], %20 {strides = array<i32>} : memref<8x128xf32, #tpu.memory_space<vmem>>, vector<8x128xf32>,
    return
  }
  func.func @transform_0(%arg0: i32) -> (i32, i32) {
    %c0_i32 = arith.constant 0 : i32
    %c0_i32_0 = arith.constant 0 : i32
    return %arg0, %c0_i32 : i32, i32
  }
  func.func @transform_1(%arg0: i32) -> (i32, i32) {
    %c0_i32 = arith.constant 0 : i32
    %c0_i32_0 = arith.constant 0 : i32
    %c0_i32_1 = arith.constant 0 : i32
    return %c0_i32, %c0_i32_0 : i32, i32
  }
  func.func @transform_2(%arg0: i32) -> (i32, i32) {
    %c0_i32 = arith.constant 0 : i32
    %c0_i32_0 = arith.constant 0 : i32
    return %arg0, %c0_i32 : i32, i32
  }
}

</mosaic_0001>

<bundles_post_ra>
// kernel: tpu_custom_call.1
= control target key start
LH: loop header
LB: loop body
LE: loop exit
PB: predicated region body
PF: predicated region fallthrough
CT: control target
= control target key end

     0   :  { %7 = vsyncpa [#allocation3], 0  ;;  %s1078_s0 = inlined_call_operand.vmem [shape: s32[8,1], index: 0, kind: input, shape index: {}]   ;;  %s1079_s1 = inlined_call_operand.hbm [shape: f32[64,128], index: 1, kind: input, shape index: {}]   ;;  %s1080_s2 = inlined_call_operand.hbm [shape: f32[8,128], index: 2, kind: output, shape index: {}]  }
   0x1   :  { %8 = vsyncpa [#allocation4], 0  ;;  %s927_s9 = smov [#allocation2]   ;;  %s879_s13 = scalar_lea.hbm %s1079_s1, 1024 }
   0x2   :  { %s16_s10 = sshll.u32 %s927_s9, 4  ;;  %p880_p0 = scmp.ne.s32.totalorder %s1079_s1, %s879_s13  ;;  %s17_s10 = int_to_ptr.vmem [resolvable:$true] %s16_s10 }
   0x3   :  { %p883_p1 = scmp.lt.u32.totalorder %s879_s13, %s1079_s1 }
   0x5   :  { %p885_p2 = pnand %p883_p1, %p880_p0 }
   0x7   :  { %888 = shalt.err (!%p885_p2)
}
   0x8   :  { %s889_s18 = scalar_lea.vmem %s17_s10, 1024  ;;  %p894_p4 = scmp.lt.s32.totalorder %s17_s10, %s17_s10 }
   0x9   :  { %p890_p3 = scmp.ne.s32.totalorder %s17_s10, %s889_s18  ;;  %p895_p5 = scmp.lt.s32.totalorder %s889_s18, %s889_s18 }
   0xb   :  { %p896_p6 = por %p895_p5, %p894_p4 }
   0xd   :  { %p897_p7 = pnand %p896_p6, %p890_p3 }
   0xf   :  { %900 = shalt.err (!%p897_p7)
}
  0x10   :  { %s928_s19 = smov 128   ;;  %s929_s20 = smov 8  }
  0x11   :  { %22 = dma.hbm_to_vmem [thread:$0]  %s1079_s1, 1024, %s17_s10, [#allocation3], %s928_s19, %s928_s19, %s929_s20  }
  0x12   :  { %923 = dma.done.wait [#allocation3], 1024  }
  0x13   :  { %924 = vsyncadd [#allocation3], 4294966272  ;;  %v930_v0 = vmov 0   ;;  %v931_v1 = vmov 0.0|0.0   ;;  %v26_v2 = vld [vmem:[%s1078_s0] sm:$0xff]  ;;  %v40_v4 = vld [vmem:[#allocation2 + $0x8] sm:$0xff] }
  0x14   :  { %874 = vset.pattern.permute.xlu0 %v930_v0  ;;  %821 = vmatprep.subr.bf16.mxu0 %v931_v1  ;;  %v39_v3 = vld [vmem:[#allocation2] sm:$0xff]  ;;  %vm27_vm0 = vcmp.gt.s32.totalorder %v26_v2, 0  ;;  %v55_v6 = vand.u32 4294901760, %v40_v4  ;;  %v41_v7 = vld [vmem:[#allocation2 + $0x10] sm:$0xff]  ;;  %v42_v8 = vld [vmem:[#allocation2 + $0x18] sm:$0xff]  ;;  %vm932_vm2 = vmmov 0  }
  0x15   :  { %785 = vmatprep.subr.bf16.mxu1 %v931_v1  ;;  %v52_v5 = vand.u32 4294901760, %v39_v3  ;;  %v43_v9 = vld [vmem:[#allocation2 + $0x20] sm:$0xff]  ;;  %v28_v10 = vsel %vm27_vm0, %v26_v2, 0  ;;  %v58_v11 = vand.u32 4294901760, %v41_v7  ;;  %v61_v12 = vand.u32 4294901760, %v42_v8  ;;  %v44_v13 = vld [vmem:[#allocation2 + $0x28] sm:$0xff] }
  0x16   :  { %v64_v14 = vand.u32 4294901760, %v43_v9  ;;  %vm29_vm1 = vcmp.lt.s32.totalorder %v28_v10, 63  ;;  %v971_v17 = vsub.f32 %v40_v4, %v55_v6  ;;  %v45_v18 = vld [vmem:[#allocation2 + $0x30] sm:$0xff]  ;;  %v46_v19 = vld [vmem:[#allocation2 + $0x38] sm:$0xff]  ;;  %v67_v24 = vand.u32 4294901760, %v44_v13  ;;  %s934_s0 = smov [#allocation5]  }
  0x17   :  { %v967_v15 = vpack.c.bf16 %v55_v6, %v52_v5  ;;  %v969_v16 = vsub.f32 %v39_v3, %v52_v5  ;;  %v30_v20 = vsel %vm29_vm1, %v28_v10, 63  ;;  %v973_v21 = vsub.f32 %v41_v7, %v58_v11  ;;  %s604_s1 = sshll.u32 %s934_s0, 4  ;;  %s605_s1 = int_to_ptr.vmem [resolvable:$true] %s604_s1 }
  0x18   :  { %v975_v22 = vsub.f32 %v42_v8, %v61_v12  ;;  %34 = vperm.xlu0 %874, %v30_v20   ;;  %v978_v23 = vpack.c.bf16 %v61_v12, %v58_v11  ;;  %v980_v25 = vsub.f32 %v43_v9, %v64_v14  ;;  %v70_v26 = vand.u32 4294901760, %v45_v18  ;;  %s901_s25 = scalar_lea.vmem %s605_s1, 128  ;;  %p906_p9 = scmp.lt.s32.totalorder %s605_s1, %s605_s1 }
  0x19   :  { %823 = vmatpush3.bf16.msra.mxu0 %v967_v15  ;;  %787 = vmatpush3.bf16.msra.mxu1 %v967_v15  ;;  %v73_v27 = vand.u32 4294901760, %v46_v19  ;;  %v985_v28 = vsub.f32 %v44_v13, %v67_v24  ;;  %v137_v31 = vand.u32 4294901760, %v969_v16  ;;  %v993_v32 = vpack.c.bf16 %v67_v24, %v64_v14  ;;  %p902_p8 = scmp.ne.s32.totalorder %s605_s1, %s901_s25  ;;  %p907_p10 = scmp.lt.s32.totalorder %s901_s25, %s901_s25 }
  0x1a   :  { %824 = vmatprep.subr.bf16.mxu0 %v931_v1  ;;  %788 = vmatprep.subr.bf16.mxu1 %v931_v1  ;;  %v987_v29 = vsub.f32 %v45_v18, %v70_v26  ;;  %v933_v33 = vmov 0.0   ;;  %v144_v34 = vand.u32 4294901760, %v971_v17  ;;  %v151_v41 = vand.u32 4294901760, %v973_v21 }
  0x1b   :  { %v989_v30 = vsub.f32 %v46_v19, %v73_v27  ;;  %744 = vmatprep.mubr.msk.f32.mxu0 %vm932_vm2, %v933_v33  ;;  %687 = vmatprep.mubr.msk.f32.mxu1 %vm932_vm2, %v933_v33  ;;  %v138_v36 = vsub.f32 %v969_v16, %v137_v31  ;;  %v1005_v38 = vpack.c.bf16 %v73_v27, %v70_v26  ;;  %v158_v42 = vand.u32 4294901760, %v975_v22  ;;  %p908_p11 = por %p907_p10, %p906_p9 }
  0x1c   :  { %v834_v35 = vpack.c.bf16 %v144_v34, %v137_v31  ;;  %v145_v37 = vsub.f32 %v971_v17, %v144_v34  ;;  %v152_v45 = vsub.f32 %v973_v21, %v151_v41  ;;  %v165_v49 = vand.u32 4294901760, %v980_v25 }
  0x1d   :  { %826 = vmatpush3.bf16.msra.mxu0 %v978_v23  ;;  %790 = vmatpush3.bf16.msra.mxu1 %v978_v23  ;;  %v139_v39 = vand.u32 4294901760, %v138_v36  ;;  %v837_v44 = vpack.c.bf16 %v158_v42, %v151_v41  ;;  %v159_v46 = vsub.f32 %v975_v22, %v158_v42  ;;  %v172_v50 = vand.u32 4294901760, %v985_v28  ;;  %p909_p12 = pnand %p908_p11, %p902_p8 }
  0x1e   :  { %827 = vmatprep.subr.bf16.mxu0 %v931_v1  ;;  %791 = vmatprep.subr.bf16.mxu1 %v931_v1  ;;  %v146_v40 = vand.u32 4294901760, %v145_v37  ;;  %v153_v47 = vand.u32 4294901760, %v152_v45  ;;  %v166_v53 = vsub.f32 %v980_v25, %v165_v49  ;;  %v179_v57 = vand.u32 4294901760, %v987_v29 }
  0x1f   :  { %v160_v48 = vand.u32 4294901760, %v159_v46  ;;  %v840_v52 = vpack.c.bf16 %v172_v50, %v165_v49  ;;  %v173_v54 = vsub.f32 %v985_v28, %v172_v50  ;;  %v186_v58 = vand.u32 4294901760, %v989_v30 }
  0x20   :  { %v798_v43 = vpack.c.bf16 %v146_v40, %v139_v39  ;;  %v167_v55 = vand.u32 4294901760, %v166_v53  ;;  %v180_v61 = vsub.f32 %v987_v29, %v179_v57  ;;  %v810_v3 = vpack.c.bf16 %v971_v17, %v969_v16 }
  0x21   :  { %829 = vmatpush3.bf16.msra.mxu0 %v993_v32  ;;  %793 = vmatpush3.bf16.msra.mxu1 %v993_v32  ;;  %v801_v51 = vpack.c.bf16 %v160_v48, %v153_v47  ;;  %v174_v56 = vand.u32 4294901760, %v173_v54  ;;  %v843_v60 = vpack.c.bf16 %v186_v58, %v179_v57  ;;  %v187_v62 = vsub.f32 %v989_v30, %v186_v58 }
  0x22   :  { %830 = vmatprep.subr.bf16.mxu0 %v931_v1  ;;  %794 = vmatprep.subr.bf16.mxu1 %v931_v1  ;;  %v181_v63 = vand.u32 4294901760, %v180_v61  ;;  %v813_v4 = vpack.c.bf16 %v975_v22, %v973_v21  ;;  %v816_v5 = vpack.c.bf16 %v985_v28, %v980_v25  ;;  %v819_v6 = vpack.c.bf16 %v989_v30, %v987_v29 }
  0x23   :  { %v804_v59 = vpack.c.bf16 %v174_v56, %v167_v55  ;;  %v188_v0 = vand.u32 4294901760, %v187_v62  ;;  %v31_v7 = vlaneseq  ;;  %vm47_vm3 = vcmask 523264  }
  0x25   :  { %832 = vmatpush3.bf16.msra.mxu0 %v1005_v38  ;;  %796 = vmatpush3.bf16.msra.mxu1 %v1005_v38  ;;  %v807_v2 = vpack.c.bf16 %v188_v0, %v181_v63  ;;  %v32_v8 = vand.u32 127, %v31_v7 }
  0x26   :  { %833 = vmatprep.subr.bf16.mxu0 %v931_v1  ;;  %797 = vmatprep.subr.bf16.mxu1 %v931_v1 }
  0x97   :  { %v35_v9 = vpop.permute.xlu0 %34 }
  0x98   :  { %vm36_vm4 = vcmp.eq.s32.totalorder %v32_v8, %v35_v9 }
  0x99   :  { %v613_v10 = vsel %vm36_vm4, 1.0, %v933_v33 }
  0x9a   :  { %v49_v11 = vsel %vm47_vm3, %v613_v10, 0 }
  0x9b   :  { %v125_v12 = vsub.f32 %v49_v11, %v49_v11 }
  0x9d   :  { %v126_v13 = vand.u32 4294901760, %v125_v12 }
  0x9f   :  { %745 = vmatmul.mubr.f32.vlgmr.msra.gmra.mrb[0].mxu0 %v126_v13  ;;  %v127_v14 = vsub.f32 %v125_v12, %v126_v13 }
  0xa0   :  { %835 = vmatpush3.bf16.msra.mxu0 %v834_v35  ;;  %763 = vmatprep.mubr.msk.f32.mxu0 %vm932_vm2, %v933_v33 }
  0xa1   :  { %836 = vmatprep.subr.bf16.mxu0 %v931_v1  ;;  %v128_v16 = vand.u32 4294901760, %v127_v14 }
  0xa3   :  { %688 = vmatmul.mubr.f32.vlgmr.msra.gmra.mrb[0].mxu1 %v128_v16 }
  0xa4   :  { %799 = vmatpush3.bf16.msra.mxu1 %v798_v43  ;;  %838 = vmatpush3.bf16.msra.mxu0 %v837_v44 }
  0xa5   :  { %800 = vmatprep.subr.bf16.mxu1 %v931_v1  ;;  %839 = vmatprep.subr.bf16.mxu0 %v931_v1 }
  0xa6   :  { %706 = vmatprep.mubr.msk.f32.mxu1 %vm932_vm2, %v933_v33 }
  0xa8   :  { %802 = vmatpush3.bf16.msra.mxu1 %v801_v51  ;;  %841 = vmatpush3.bf16.msra.mxu0 %v840_v52 }
  0xa9   :  { %803 = vmatprep.subr.bf16.mxu1 %v931_v1  ;;  %842 = vmatprep.subr.bf16.mxu0 %v931_v1 }
  0xac   :  { %805 = vmatpush3.bf16.msra.mxu1 %v804_v59  ;;  %844 = vmatpush3.bf16.msra.mxu0 %v843_v60 }
  0xad   :  { %806 = vmatprep.subr.bf16.mxu1 %v931_v1  ;;  %845 = vmatprep.subr.bf16.mxu0 %v931_v1 }
  0xaf   :  { %764 = vmatmul.mubr.msk.f32.vlgmr.msra.gmra.mrb[0].mxu0 %vm47_vm3, %v613_v10 }
  0xb0   :  { %808 = vmatpush3.bf16.msra.mxu1 %v807_v2  ;;  %847 = vmatpush3.bf16.msra.mxu0 %v967_v15 }
  0xb1   :  { %809 = vmatprep.subr.bf16.mxu1 %v931_v1  ;;  %848 = vmatprep.subr.bf16.mxu0 %v931_v1 }
  0xb2   :  { %782 = vmatprep.mubr.msk.f32.mxu0 %vm932_vm2, %v933_v33 }
  0xb3   :  { %707 = vmatmul.mubr.msk.f32.vlgmr.msra.gmra.mrb[0].mxu1 %vm47_vm3, %v613_v10 }
  0xb4   :  { %811 = vmatpush3.bf16.msra.mxu1 %v810_v3  ;;  %850 = vmatpush3.bf16.msra.mxu0 %v978_v23 }
  0xb5   :  { %812 = vmatprep.subr.bf16.mxu1 %v931_v1  ;;  %851 = vmatprep.subr.bf16.mxu0 %v931_v1 }
  0xb6   :  { %725 = vmatprep.mubr.msk.f32.mxu1 %vm932_vm2, %v933_v33 }
  0xb8   :  { %814 = vmatpush3.bf16.msra.mxu1 %v813_v4  ;;  %853 = vmatpush3.bf16.msra.mxu0 %v993_v32 }
  0xb9   :  { %815 = vmatprep.subr.bf16.mxu1 %v931_v1  ;;  %854 = vmatprep.subr.bf16.mxu0 %v931_v1 }
  0xbc   :  { %817 = vmatpush3.bf16.msra.mxu1 %v816_v5  ;;  %856 = vmatpush3.bf16.msra.mxu0 %v1005_v38 }
  0xbd   :  { %818 = vmatprep.subr.bf16.mxu1 %v931_v1 }
  0xbf   :  { %783 = vmatmul.mubr.msk.f32.vlgmr.msra.gmra.mrb[0].mxu0 %vm47_vm3, %v613_v10 }
  0xc0   :  { %820 = vmatpush3.bf16.msra.mxu1 %v819_v6 }
  0xc3   :  { %726 = vmatmul.mubr.f32.vlgmr.msra.gmra.mrb[0].mxu1 %v125_v12 }
 0x192   :  { %v584_v15 = vpop.f32.mrb[0].mxu0 }
 0x193   :  { %v784_v17 = vpop.f32.mrb[1].mxu0 }
 0x196   :  { %v329_v18 = vpop.f32.mrb[0].mxu1 }
 0x197   :  { %v857_v19 = vadd.f32 %v584_v15, %v329_v18  ;;  %v727_v20 = vpop.f32.mrb[1].mxu1 }
 0x199   :  { %588 = vmax.xlane.f32.xlu0 %v857_v19 }
 0x226   :  { %v589_v21 = vpop.xlane.xlu0 %588 }
 0x227   :  { %v590_v22 = vsub.f32 %v857_v19, %v589_v21 }
 0x229   :  { %v591_v23 = vmul.f32 1.442695, %v590_v22 }
 0x22b   :  { %875 = vpow2.f32 %v591_v23 }
 0x235   :  { %v876_v24 = vpop.eup %875 }
 0x236   :  { %593 = vadd.xlane.f32.xlu1 %v876_v24 }
 0x2c3   :  { %v594_v25 = vpop.xlane.xlu1 %593 }
 0x2c4   :  { %877 = vrcp.f32 %v594_v25 }
 0x2ce   :  { %v878_v1 = vpop.eup %877 }
 0x2cf   :  { %v596_v26 = vmul.f32 %v878_v1, %v876_v24 }
 0x2d1   :  { %597 = vst [vmem:[#allocation5] sm:$0xff] %v596_v26 }
 0x2d2   :  { %912 = shalt.err (!%p909_p12)
}
 0x2d3   :  { %s913_s28 = scalar_lea.hbm %s1080_s2, 128 }
 0x2d4   :  { %p914_p13 = scmp.ne.s32.totalorder %s1080_s2, %s913_s28  ;;  %p917_p0 = scmp.lt.u32.totalorder %s913_s28, %s1080_s2 }
 0x2d6   :  { %p919_p1 = pnand %p917_p0, %p914_p13 }
 0x2d8   :  { %922 = shalt.err (!%p919_p1)
}
 0x2d9   :  { %607 = dma.vmem_to_hbm [thread:$0]  %s605_s1, 128, %s1080_s2, [#allocation4]  }
 0x2da   :  { %925 = dma.done.wait [#allocation4], 128  }
 0x2db   :  { %926 = vsyncadd [#allocation4], 4294967168 }
 0x2dc   :  { %611 = vsyncpa [#allocation3], 1 }
 0x2dd   :  { %612 = vsyncpa [#allocation4], 1 }

</bundles_post_ra>
